<compile_context>
chip_gen: v7x
topology: tpu7x:2x2x1
jax: 0.10.0
libtpu: 0.0.40
codegen_flags: <defaults>
</compile_context>

<pallas_src>
import functools

import jax
import jax.numpy as jnp
from jax import lax
from jax.experimental import pallas as pl
from jax.experimental.pallas import tpu as pltpu


def _round_up(x, m):
    return ((x + m - 1) // m) * m


def _pick_chunk(n, target, step=8):
    """Largest multiple of `step` that divides n and is <= target (n is a multiple of step)."""
    c = min(n, target)
    c -= c % step
    c = max(c, step)
    while n % c:
        c -= step
    return c


# ----------------------------------------------------------------------------
# 1) Input projection: gates_in = x @ [Wih_f | Wih_b] + [b_f | b_b]
#    One big (Rc, Din) @ (Din, 8H) matmul per grid step -- pure 2D, lane-dense.
# ----------------------------------------------------------------------------
def _in_proj_kernel(x_ref, w_ref, b_ref, gf_ref, gb_ref, *, G):
    g = jnp.dot(x_ref[...], w_ref[...],
                preferred_element_type=jnp.float32) + b_ref[...]
    gf_ref[...] = g[:, :G].astype(gf_ref.dtype)      # 128-aligned lane slice
    gb_ref[...] = g[:, G:].astype(gb_ref.dtype)


def input_projection(x2d, w_in, b_in, H):
    """x2d: (N, Din); w_in: (Din, 8H); b_in: (1, 8H) -> (gates_f, gates_b) each (N, 4H)."""
    N, Din = x2d.shape
    G = 4 * H
    Rc = _pick_chunk(N, 1024)
    kernel = functools.partial(_in_proj_kernel, G=G)
    return pl.pallas_call(
        kernel,
        out_shape=(jax.ShapeDtypeStruct((N, G), jnp.float32),
                   jax.ShapeDtypeStruct((N, G), jnp.float32)),
        grid_spec=pltpu.PrefetchScalarGridSpec(
            num_scalar_prefetch=0,
            grid=(N // Rc,),
            in_specs=[
                pl.BlockSpec((Rc, Din), lambda r: (r, 0)),
                pl.BlockSpec((Din, 2 * G), lambda r: (0, 0)),
                pl.BlockSpec((1, 2 * G), lambda r: (0, 0)),
            ],
            out_specs=[
                pl.BlockSpec((Rc, G), lambda r: (r, 0)),
                pl.BlockSpec((Rc, G), lambda r: (r, 0)),
            ],
        ),
        compiler_params=pltpu.CompilerParams(
            dimension_semantics=("parallel",),
            vmem_limit_bytes=32 * 1024 * 1024),
    )(x2d, w_in, b_in)


# ----------------------------------------------------------------------------
# 2) Fused bidirectional LSTM recurrence.  grid = (T/Tc,), sequential ("arbitrary").
#    Per grid step: Tc forward steps (times c*Tc+j) and Tc backward steps
#    (times T-1-(c*Tc+j)) in one unrolled fori_loop.  Only h @ Whh per step.
# ----------------------------------------------------------------------------
def _bilstm_kernel(gf_ref, gb_ref, whhf_ref, whhb_ref, len_ref,
                   outf_ref, outb_ref,
                   hf_sc, cf_sc, hb_sc, cb_sc, *, T, Tc, H):
    c = pl.program_id(0)

    @pl.when(c == 0)
    def _():
        hf_sc[...] = jnp.zeros_like(hf_sc)
        cf_sc[...] = jnp.zeros_like(cf_sc)
        hb_sc[...] = jnp.zeros_like(hb_sc)
        cb_sc[...] = jnp.zeros_like(cb_sc)

    lens = len_ref[...]            # (B, 1) int32, loaded once per chunk (hoisted)
    whh_f = whhf_ref[...]          # weights loaded once per chunk
    whh_b = whhb_ref[...]

    def cell(gate_pre, h_prev, c_prev, whh):
        g = gate_pre + jnp.dot(h_prev, whh, preferred_element_type=jnp.float32)
        i_g = jax.nn.sigmoid(g[:, 0:H])
        f_g = jax.nn.sigmoid(g[:, H:2 * H])
        g_g = jnp.tanh(g[:, 2 * H:3 * H])
        o_g = jax.nn.sigmoid(g[:, 3 * H:4 * H])
        c_new = f_g * c_prev + i_g * g_g
        h_new = o_g * jnp.tanh(c_new)
        return h_new, c_new

    def step(j, carry):
        # ---- forward direction, global time t_f = c*Tc + j ----
        t_f = c * Tc + j
        h_new, c_new = cell(gf_ref[j], hf_sc[...], cf_sc[...], whh_f)
        valid = t_f < lens                               # (B, 1) bool
        hf_sc[...] = jnp.where(valid, h_new, hf_sc[...])
        cf_sc[...] = jnp.where(valid, c_new, cf_sc[...])
        outf_ref[j] = jnp.where(valid, h_new, 0.0).astype(outf_ref.dtype)

        # ---- backward direction, global time t_b = T-1 - (c*Tc + j) ----
        jj = Tc - 1 - j
        t_b = T - 1 - t_f
        hb_new, cb_new = cell(gb_ref[jj], hb_sc[...], cb_sc[...], whh_b)
        valid_b = t_b < lens
        hb_sc[...] = jnp.where(valid_b, hb_new, hb_sc[...])
        cb_sc[...] = jnp.where(valid_b, cb_new, cb_sc[...])
        outb_ref[jj] = jnp.where(valid_b, hb_new, 0.0).astype(outb_ref.dtype)
        return carry

    lax.fori_loop(0, Tc, step, 0, unroll=True)


def bilstm_layer(gates_f, gates_b, whh_f, whh_b, len_b1, *, Tc):
    """gates_*: (T_pad, B_pad, 4H) time-major -> (out_f, out_b) each (T_pad, B_pad, H)."""
    T, B, G = gates_f.shape
    H = G // 4
    nC = T // Tc
    kernel = functools.partial(_bilstm_kernel, T=T, Tc=Tc, H=H)
    return pl.pallas_call(
        kernel,
        out_shape=(jax.ShapeDtypeStruct((T, B, H), jnp.float32),
                   jax.ShapeDtypeStruct((T, B, H), jnp.float32)),
        grid_spec=pltpu.PrefetchScalarGridSpec(
            num_scalar_prefetch=0,
            grid=(nC,),
            in_specs=[
                pl.BlockSpec((Tc, B, G), lambda c: (c, 0, 0)),
                pl.BlockSpec((Tc, B, G), lambda c: (nC - 1 - c, 0, 0)),
                pl.BlockSpec((H, G), lambda c: (0, 0)),
                pl.BlockSpec((H, G), lambda c: (0, 0)),
                pl.BlockSpec((B, 1), lambda c: (0, 0)),
            ],
            out_specs=[
                pl.BlockSpec((Tc, B, H), lambda c: (c, 0, 0)),
                pl.BlockSpec((Tc, B, H), lambda c: (nC - 1 - c, 0, 0)),
            ],
            scratch_shapes=[pltpu.VMEM((B, H), jnp.float32)] * 4,
        ),
        compiler_params=pltpu.CompilerParams(
            dimension_semantics=("arbitrary",),
            vmem_limit_bytes=32 * 1024 * 1024),
    )(gates_f, gates_b, whh_f, whh_b, len_b1)


# ----------------------------------------------------------------------------
# 3) tanh + attention + output-linear + softmax.  grid = (B_pad/Bt,), a whole tile
#    of batch rows per step; one batched projection matmul; scores via VPU + lane
#    reduction; tmax = max(sen_lengths) comes in through scalar prefetch (SMEM).
#    fwd/bwd halves are kept separate (weights split in the wrapper) to avoid any
#    in-kernel lane concatenation.
# ----------------------------------------------------------------------------
def _attn_head_kernel(tmax_ref, hf_ref, hb_ref, waf_ref, wab_ref, ba_ref,
                      u_ref, wof_ref, wob_ref, bo_ref, prob_ref, att_ref, *, H):
    T, Bt, _ = hf_ref.shape
    hf = jnp.tanh(hf_ref[...])                        # (T, Bt, H)  tanh(sen_outs), fwd half
    hb = jnp.tanh(hb_ref[...])                        # bwd half

    # batched projection over all T*Bt rows (Bt is a multiple of 8 -> free reshape)
    proj = jnp.tanh(
        jnp.dot(hf.reshape(T * Bt, H), waf_ref[...], preferred_element_type=jnp.float32)
        + jnp.dot(hb.reshape(T * Bt, H), wab_ref[...], preferred_element_type=jnp.float32)
        + ba_ref[...])                                # (T*Bt, 2H)
    proj = proj.reshape(T, Bt, 2 * H)

    # score = proj . u  (VPU multiply + lane reduction, no 1-column MXU matmul)
    sc = jnp.sum(proj * u_ref[...], axis=-1, keepdims=True)       # (T, Bt, 1)

    # softmax only over the packed length max(sen_lengths)  (pad_packed semantics)
    tidx = lax.broadcasted_iota(jnp.int32, sc.shape, 0)
    sc = jnp.where(tidx < tmax_ref[0], sc, -jnp.inf)
    m = jnp.max(sc, axis=0, keepdims=True)
    e = jnp.exp(sc - m)
    att = e / jnp.sum(e, axis=0, keepdims=True)                   # (T, Bt, 1)

    outs_f = jnp.sum(att * hf, axis=0)                            # (Bt, H)
    outs_b = jnp.sum(att * hb, axis=0)                            # (Bt, H)
    res = (jnp.dot(outs_f, wof_ref[...], preferred_element_type=jnp.float32)
           + jnp.dot(outs_b, wob_ref[...], preferred_element_type=jnp.float32)
           + bo_ref[...])                                         # (Bt, O)
    res = res - jnp.max(res, axis=1, keepdims=True)
    er = jnp.exp(res)
    prob_ref[...] = (er / jnp.sum(er, axis=1, keepdims=True)).astype(prob_ref.dtype)
    att_ref[...] = att.astype(att_ref.dtype)


def attention_head(hf, hb, tmax, wa, ba, u, wo, bo):
    """hf/hb: (T_pad, B_pad, H) time-major -> (prob (B_pad, O), att (T_pad, B_pad, 1))."""
    T, B, H = hf.shape
    O = wo.shape[1]
    Bt = _pick_chunk(B, 64)
    wa_f, wa_b = wa[:H, :], wa[H:, :]
    wo_f, wo_b = wo[:H, :], wo[H:, :]
    u_row = u.reshape(1, 2 * H)
    tmax_arr = jnp.asarray(tmax, jnp.int32).reshape(1)
    kernel = functools.partial(_attn_head_kernel, H=H)
    return pl.pallas_call(
        kernel,
        out_shape=(jax.ShapeDtypeStruct((B, O), jnp.float32),
                   jax.ShapeDtypeStruct((T, B, 1), jnp.float32)),
        grid_spec=pltpu.PrefetchScalarGridSpec(
            num_scalar_prefetch=1,
            grid=(B // Bt,),
            in_specs=[
                pl.BlockSpec((T, Bt, H), lambda i, tm: (0, i, 0)),
                pl.BlockSpec((T, Bt, H), lambda i, tm: (0, i, 0)),
                pl.BlockSpec((H, 2 * H), lambda i, tm: (0, 0)),
                pl.BlockSpec((H, 2 * H), lambda i, tm: (0, 0)),
                pl.BlockSpec((1, 2 * H), lambda i, tm: (0, 0)),
                pl.BlockSpec((1, 2 * H), lambda i, tm: (0, 0)),
                pl.BlockSpec((H, O), lambda i, tm: (0, 0)),
                pl.BlockSpec((H, O), lambda i, tm: (0, 0)),
                pl.BlockSpec((1, O), lambda i, tm: (0, 0)),
            ],
            out_specs=[
                pl.BlockSpec((Bt, O), lambda i, tm: (i, 0)),
                pl.BlockSpec((T, Bt, 1), lambda i, tm: (0, i, 0)),
            ],
        ),
        compiler_params=pltpu.CompilerParams(
            dimension_semantics=("parallel",),
            vmem_limit_bytes=32 * 1024 * 1024),
    )(tmax_arr, hf, hb, wa_f, wa_b, ba, u_row, wo_f, wo_b, bo)


# ----------------------------------------------------------------------------
# Full BLSTM forward (embedding gather / padding / cheap reshapes are JAX glue).
# ----------------------------------------------------------------------------
def blstm_forward(sen_batch, sen_lengths, emb_w, lstm_params, wa, ba, u, wo, bo, *, Tc=8):
    B, T = sen_batch.shape
    H = lstm_params[0]["whh_f"].shape[0]

    x_emb = emb_w[sen_batch]                              # (B, T, D) embedding lookup (glue)
    B_pad = _round_up(max(B, 8), 8)                       # sublane-aligned batch
    T_pad = _round_up(T, Tc)                              # whole time chunks
    x_tbd = jnp.transpose(x_emb, (1, 0, 2))               # time-major (T, B, D)
    x_tbd = jnp.pad(x_tbd, ((0, T_pad - T), (0, B_pad - B), (0, 0)))
    len_b1 = jnp.pad(sen_lengths.astype(jnp.int32), (0, B_pad - B)).reshape(B_pad, 1)
    tmax = jnp.max(sen_lengths).astype(jnp.int32)

    x2d = x_tbd.reshape(T_pad * B_pad, -1)                # free leading-dim collapse
    hf = hb = None
    for li, p in enumerate(lstm_params):
        if li > 0:
            x2d = jnp.concatenate([hf, hb], axis=-1).reshape(T_pad * B_pad, 2 * H)
        w_in = jnp.concatenate([p["wih_f"], p["wih_b"]], axis=1)    # (Din, 8H)
        b_in = jnp.concatenate([p["b_f"], p["b_b"]], axis=1)        # (1, 8H)
        gf2d, gb2d = input_projection(x2d, w_in, b_in, H)
        gates_f = gf2d.reshape(T_pad, B_pad, 4 * H)
        gates_b = gb2d.reshape(T_pad, B_pad, 4 * H)
        hf, hb = bilstm_layer(gates_f, gates_b, p["whh_f"], p["whh_b"], len_b1, Tc=Tc)

    prob, att3 = attention_head(hf, hb, tmax, wa, ba, u, wo, bo)
    out_prob = prob[:B]                                   # drop padded batch rows
    att_w = jnp.transpose(att3[:, :B, 0])[:, :T]          # (B, T)
    return out_prob, att_w


# ----------------------------------------------------------------------------
# Pure-JAX reference (same semantics) for a correctness check.
# ----------------------------------------------------------------------------
def ref_forward(sen_batch, sen_lengths, emb_w, lstm_params, wa, ba, u, wo, bo):
    x = emb_w[sen_batch]                                  # (B, T, D)
    B, T, _ = x.shape
    h_in = x
    for p in lstm_params:
        outs_dirs = []
        for reverse in (False, True):
            wih, whh, b = ((p["wih_b"], p["whh_b"], p["b_b"]) if reverse
                           else (p["wih_f"], p["whh_f"], p["b_f"]))
            H = whh.shape[0]
            h = jnp.zeros((B, H)); c = jnp.zeros((B, H))
            out = jnp.zeros((B, T, H))
            ts = range(T - 1, -1, -1) if reverse else range(T)
            for t in ts:
                g = h_in[:, t, :] @ wih + h @ whh + b
                i_g = jax.nn.sigmoid(g[:, :H]); f_g = jax.nn.sigmoid(g[:, H:2 * H])
                g_g = jnp.tanh(g[:, 2 * H:3 * H]); o_g = jax.nn.sigmoid(g[:, 3 * H:])
                cn = f_g * c + i_g * g_g
                hn = o_g * jnp.tanh(cn)
                valid = (t < sen_lengths)[:, None]
                h = jnp.where(valid, hn, h); c = jnp.where(valid, cn, c)
                out = out.at[:, t, :].set(jnp.where(valid, h, 0.0))
            outs_dirs.append(out)
        h_in = jnp.concatenate(outs_dirs, axis=-1)
    hh = jnp.tanh(h_in)
    proj = jnp.tanh(hh @ wa + ba)
    sc = (proj @ u)[..., 0]
    tmax = jnp.max(sen_lengths)
    sc = jnp.where(jnp.arange(T)[None, :] < tmax, sc, -jnp.inf)
    att = jax.nn.softmax(sc, axis=1)
    outs = jnp.einsum("bt,btd->bd", att, hh)
    res = outs @ wo + bo
    return jax.nn.softmax(res, axis=1), att


if __name__ == "__main__":
    # small, deterministic problem
    V, D, H, NUM_LAYERS, O = 20, 16, 32, 1, 4      # vocab, input_dim, hidden_dim, layers, output_dim
    B, T = 2, 8                                    # batch, sequence length

    key = jax.random.PRNGKey(0)
    keys = jax.random.split(key, 8)

    emb_w = 0.5 * jax.random.normal(keys[0], (V, D), jnp.float32)
    sen_lengths = jnp.array([8, 5], dtype=jnp.int32)
    sen_batch = jax.random.randint(keys[1], (B, T), 1, V)
    sen_batch = jnp.where(jnp.arange(T)[None, :] < sen_lengths[:, None], sen_batch, 0)

    # LSTM params (PyTorch layout transposed: W_ih -> (Din, 4H), W_hh -> (H, 4H),
    # bias = b_ih + b_hh as (1, 4H)); gate order i, f, g, o.
    lstm_params = []
    k = keys[2]
    for layer in range(NUM_LAYERS):
        Din = D if layer == 0 else 2 * H
        k, *sub = jax.random.split(k, 7)
        s = 1.0 / jnp.sqrt(jnp.float32(H))
        lstm_params.append(dict(
            wih_f=jax.random.uniform(sub[0], (Din, 4 * H), jnp.float32, -s, s),
            whh_f=jax.random.uniform(sub[1], (H, 4 * H), jnp.float32, -s, s),
            b_f=jax.random.uniform(sub[2], (1, 4 * H), jnp.float32, -s, s),
            wih_b=jax.random.uniform(sub[3], (Din, 4 * H), jnp.float32, -s, s),
            whh_b=jax.random.uniform(sub[4], (H, 4 * H), jnp.float32, -s, s),
            b_b=jax.random.uniform(sub[5], (1, 4 * H), jnp.float32, -s, s),
        ))

    # attention + output params
    wa = 0.1 * jax.random.normal(keys[3], (2 * H, 2 * H), jnp.float32)
    ba = 0.1 * jax.random.normal(keys[4], (1, 2 * H), jnp.float32)
    u = 0.1 * jax.random.normal(keys[5], (2 * H, 1), jnp.float32)
    wo = 0.1 * jax.random.normal(keys[6], (2 * H, O), jnp.float32)
    bo = 0.1 * jax.random.normal(keys[7], (1, O), jnp.float32)

    out_prob, att_w = blstm_forward(sen_batch, sen_lengths, emb_w, lstm_params,
                                    wa, ba, u, wo, bo)
    jax.block_until_ready(out_prob)
    jax.block_until_ready(att_w)

    ref_prob, ref_att = ref_forward(sen_batch, sen_lengths, emb_w, lstm_params,
                                    wa, ba, u, wo, bo)
    assert out_prob.shape == (B, O) and att_w.shape == (B, T)
    assert jnp.allclose(out_prob, ref_prob, atol=2e-3, rtol=2e-3), "out_prob mismatch"
    assert jnp.allclose(att_w, ref_att, atol=2e-3, rtol=2e-3), "att_w mismatch"
    assert jnp.allclose(jnp.sum(out_prob, axis=1), 1.0, atol=1e-4)

    print("KERNEL_OK")
</pallas_src>

<mosaic_0001>
module attributes {stable_mosaic.version = 11 : i64} {
  func.func @_in_proj_kernel(%arg0: i32, %arg1: memref<64x16xf32, #tpu.memory_space<vmem>>, %arg2: memref<16x256xf32, #tpu.memory_space<vmem>>, %arg3: memref<1x256xf32, #tpu.memory_space<vmem>>, %arg4: memref<64x128xf32, #tpu.memory_space<vmem>>, %arg5: memref<64x128xf32, #tpu.memory_space<vmem>>) attributes {dimension_semantics = [#tpu.dimension_semantics<parallel>], iteration_bounds = array<i64: 1>, scalar_prefetch = 0 : i64, scratch_operands = 0 : i64, tpu.core_type = #tpu.core_type<tc>, window_params = [{transform_indices = @transform_0, window_bounds = array<i64: 64, 16>}, {pipeline_mode = #tpu.pipeline_mode<synchronous>, transform_indices = @transform_1, window_bounds = array<i64: 16, 256>}, {pipeline_mode = #tpu.pipeline_mode<synchronous>, transform_indices = @transform_2, window_bounds = array<i64: 1, 256>}, {transform_indices = @transform_3, window_bounds = array<i64: 64, 128>}, {transform_indices = @transform_4, window_bounds = array<i64: 64, 128>}]} {
    %c0 = arith.constant 0 : index
    %c0_0 = arith.constant 0 : index
    %0 = vector.load %arg1[%c0, %c0_0] : memref<64x16xf32, #tpu.memory_space<vmem>>, vector<64x16xf32>
    %c0_1 = arith.constant 0 : index
    %c0_2 = arith.constant 0 : index
    %1 = vector.load %arg2[%c0_1, %c0_2] : memref<16x256xf32, #tpu.memory_space<vmem>>, vector<16x256xf32>
    %cst = arith.constant dense<0.000000e+00> : vector<64x256xf32>
    %2 = tpu.matmul %0, %1, %cst {dimension_numbers = #tpu.dot_dimension_numbers<[1], [0], [0], [1], [0, 0, 1, 1], [], []>} : vector<64x16xf32>, vector<16x256xf32>, vector<64x256xf32> -> vector<64x256xf32>
    %c0_3 = arith.constant 0 : index
    %c0_4 = arith.constant 0 : index
    %3 = vector.load %arg3[%c0_3, %c0_4] : memref<1x256xf32, #tpu.memory_space<vmem>>, vector<1x256xf32>
    %4 = vector.broadcast %3 : vector<1x256xf32> to vector<64x256xf32>
    %5 = arith.addf %2, %4 : vector<64x256xf32>
    %6 = vector.extract_strided_slice %5 {offsets = [0, 0], sizes = [64, 128], strides = [1, 1]} : vector<64x256xf32> to vector<64x128xf32>
    %c0_5 = arith.constant 0 : index
    %c0_6 = arith.constant 0 : index
    %7 = vector.load %arg4[%c0_5, %c0_6] : memref<64x128xf32, #tpu.memory_space<vmem>>, vector<64x128xf32>
    tpu.vector_store %arg4[%c0_5, %c0_6], %6 {strides = array<i32>} : memref<64x128xf32, #tpu.memory_space<vmem>>, vector<64x128xf32>,
    %8 = vector.extract_strided_slice %5 {offsets = [0, 128], sizes = [64, 128], strides = [1, 1]} : vector<64x256xf32> to vector<64x128xf32>
    %c0_7 = arith.constant 0 : index
    %c0_8 = arith.constant 0 : index
    %9 = vector.load %arg5[%c0_7, %c0_8] : memref<64x128xf32, #tpu.memory_space<vmem>>, vector<64x128xf32>
    tpu.vector_store %arg5[%c0_7, %c0_8], %8 {strides = array<i32>} : memref<64x128xf32, #tpu.memory_space<vmem>>, vector<64x128xf32>,
    return
  }
  func.func @transform_0(%arg0: i32) -> (i32, i32) {
    %c0_i32 = arith.constant 0 : i32
    %c0_i32_0 = arith.constant 0 : i32
    return %arg0, %c0_i32 : i32, i32
  }
  func.func @transform_1(%arg0: i32) -> (i32, i32) {
    %c0_i32 = arith.constant 0 : i32
    %c0_i32_0 = arith.constant 0 : i32
    %c0_i32_1 = arith.constant 0 : i32
    return %c0_i32, %c0_i32_0 : i32, i32
  }
  func.func @transform_2(%arg0: i32) -> (i32, i32) {
    %c0_i32 = arith.constant 0 : i32
    %c0_i32_0 = arith.constant 0 : i32
    %c0_i32_1 = arith.constant 0 : i32
    return %c0_i32, %c0_i32_0 : i32, i32
  }
  func.func @transform_3(%arg0: i32) -> (i32, i32) {
    %c0_i32 = arith.constant 0 : i32
    %c0_i32_0 = arith.constant 0 : i32
    return %arg0, %c0_i32 : i32, i32
  }
  func.func @transform_4(%arg0: i32) -> (i32, i32) {
    %c0_i32 = arith.constant 0 : i32
    %c0_i32_0 = arith.constant 0 : i32
    return %arg0, %c0_i32 : i32, i32
  }
}

</mosaic_0001>

<bundles_post_ra>
// kernel: tpu_custom_call.1
= control target key start
LH: loop header
LB: loop body
LE: loop exit
PB: predicated region body
PF: predicated region fallthrough
CT: control target
= control target key end

     0   :  { %10 = vsyncpa [#allocation3], 0  ;;  %v295_v5 = vmov 0.0   ;;  %vm42_vm0 = vcmask 130048   ;;  %s410_s0 = inlined_call_operand.vmem [shape: f32[64,16], index: 0, kind: input, shape index: {}]   ;;  %s411_s1 = inlined_call_operand.vmem [shape: f32[16,256], index: 1, kind: input, shape index: {}]   ;;  %s412_s2 = inlined_call_operand.vmem [shape: f32[1,256], index: 2, kind: input, shape index: {}]   ;;  %s413_s3 = inlined_call_operand.hbm [shape: f32[64,128], index: 3, kind: output, shape index: {0}]   ;;  %s414_s4 = inlined_call_operand.hbm [shape: f32[64,128], index: 4, kind: output, shape index: {1}]  }
   0x1   :  { %v27_v0 = vld [vmem:[%s411_s1 + $0x8] sm:$0xff]  ;;  %v29_v1 = vld [vmem:[%s411_s1 + $0x18] sm:$0xff]  ;;  %v26_v2 = vld [vmem:[%s411_s1] sm:$0xff]  ;;  %131 = vmatprep.mubr.f32.mxu0 %v295_v5  ;;  %155 = vmatprep.mubr.f32.mxu1 %v295_v5 }
   0x2   :  { %v236_v3 = vpack.c.bf16 %v29_v1, %v27_v0  ;;  %v28_v4 = vld [vmem:[%s411_s1 + $0x10] sm:$0xff]  ;;  %v18_v7 = vld [vmem:[%s410_s0] sm:$0xff] }
   0x3   :  { %v238_v6 = vpack.c.bf16 %v28_v4, %v26_v2  ;;  %v22_v8 = vld [vmem:[%s410_s0 + $0x20] sm:$0xff] }
   0x4   :  { %237 = vmatprep.subr.bf16.mxu0 %v236_v3  ;;  %240 = vmatprep.subr.bf16.mxu1 %v236_v3 }
   0x5   :  { %239 = vmatpush1.bf16.msra.mxu0 %v238_v6  ;;  %241 = vmatpush1.bf16.msra.mxu1 %v238_v6 }
   0x6   :  { %11 = vsyncpa [#allocation5], 0  ;;  %v19_v9 = vld [vmem:[%s410_s0 + $0x8] sm:$0xff]  ;;  %v20_v11 = vld [vmem:[%s410_s0 + $0x10] sm:$0xff]  ;;  %v32_v15 = vlaneseq  ;;  %s297_s14 = smov [#allocation4]  }
   0x7   :  { %v23_v10 = vld [vmem:[%s410_s0 + $0x28] sm:$0xff]  ;;  %v24_v12 = vld [vmem:[%s410_s0 + $0x30] sm:$0xff]  ;;  %v21_v13 = vld [vmem:[%s410_s0 + $0x18] sm:$0xff]  ;;  %s213_s15 = sshll.u32 %s297_s14, 4  ;;  %s374_s15 = int_to_ptr.vmem [resolvable:$true] %s213_s15 }
   0x8   :  { %228 = vmatmul.mubr.msk.f32.vlgmr.msra.gmra.mrb[0].mxu0 %vm42_vm0, %v18_v7  ;;  %232 = vmatmul.mubr.msk.f32.vlgmr.msra.gmra.mrb[0].mxu1 %vm42_vm0, %v22_v8  ;;  %v25_v14 = vld [vmem:[%s410_s0 + $0x38] sm:$0xff]  ;;  %v33_v16 = vshrl.u32 %v32_v15, 7  ;;  %v30_v18 = vld [vmem:[%s412_s2] sm:$0x3]  ;;  %s296_s0 = smov [#allocation2]  }
   0x9   :  { %137 = vmatprep.mubr.f32.mxu0 %v295_v5  ;;  %161 = vmatprep.mubr.f32.mxu1 %v295_v5  ;;  %s201_s2 = sshll.u32 %s296_s0, 4  ;;  %s372_s2 = int_to_ptr.vmem [resolvable:$true] %s201_s2 }
   0xa   :  { %v34_v17 = vsub.s32 0, %v33_v16  ;;  %v38_v19 = vsub.s32 1, %v33_v16  ;;  %s247_s16 = scalar_lea.vmem %s372_s2, 1024  ;;  %p252_p1 = scmp.lt.s32.totalorder %s372_s2, %s372_s2 }
   0xb   :  { %p248_p0 = scmp.ne.s32.totalorder %s372_s2, %s247_s16  ;;  %p253_p2 = scmp.lt.s32.totalorder %s247_s16, %s247_s16 }
   0xc   :  { %229 = vmatmul.mubr.msk.f32.gmra.mrb[2].mxu0 %vm42_vm0, %v19_v9  ;;  %233 = vmatmul.mubr.msk.f32.gmra.mrb[2].mxu1 %vm42_vm0, %v23_v10  ;;  %v35_v20 = vrot.slane %v30_v18, %v34_v17  ;;  %v39_v21 = vrot.slane %v30_v18, %v38_v19 }
   0xd   :  { %143 = vmatprep.mubr.f32.mxu0 %v295_v5  ;;  %167 = vmatprep.mubr.f32.mxu1 %v295_v5  ;;  %p254_p3 = por %p253_p2, %p252_p1 }
   0xf   :  { %p255_p4 = pnand %p254_p3, %p248_p0 }
  0x10   :  { %230 = vmatmul.mubr.msk.f32.gmra.mrb[4].mxu0 %vm42_vm0, %v20_v11  ;;  %234 = vmatmul.mubr.msk.f32.gmra.mrb[4].mxu1 %vm42_vm0, %v24_v12 }
  0x11   :  { %149 = vmatprep.mubr.f32.mxu0 %v295_v5  ;;  %173 = vmatprep.mubr.f32.mxu1 %v295_v5 }
  0x14   :  { %231 = vmatmul.mubr.msk.f32.gmra.mrb[6].mxu0 %vm42_vm0, %v21_v13  ;;  %235 = vmatmul.mubr.msk.f32.gmra.mrb[6].mxu1 %vm42_vm0, %v25_v14 }
  0xdb   :  { %v133_v22 = vpop.f32.mrb[0].mxu0  ;;  %v157_v23 = vpop.f32.mrb[0].mxu1 }
  0xdc   :  { %v134_v24 = vadd.f32 %v133_v22, %v35_v20  ;;  %v158_v25 = vadd.f32 %v157_v23, %v35_v20  ;;  %v135_v26 = vpop.f32.mrb[1].mxu0  ;;  %v159_v27 = vpop.f32.mrb[1].mxu1 }
  0xdd   :  { %v136_v28 = vadd.f32 %v135_v26, %v39_v21  ;;  %v160_v29 = vadd.f32 %v159_v27, %v39_v21 }
  0xde   :  { %180 = vst [vmem:[#allocation2] sm:$0xff] %v134_v24  ;;  %184 = vst [vmem:[#allocation2 + $0x20] sm:$0xff] %v158_v25 }
  0xdf   :  { %188 = vst [vmem:[#allocation4] sm:$0xff] %v136_v28  ;;  %192 = vst [vmem:[#allocation4 + $0x20] sm:$0xff] %v160_v29  ;;  %v139_v30 = vpop.f32.mrb[2].mxu0  ;;  %v163_v31 = vpop.f32.mrb[2].mxu1 }
  0xe0   :  { %v140_v32 = vadd.f32 %v139_v30, %v35_v20  ;;  %v164_v33 = vadd.f32 %v163_v31, %v35_v20  ;;  %v141_v34 = vpop.f32.mrb[3].mxu0  ;;  %v165_v35 = vpop.f32.mrb[3].mxu1 }
  0xe1   :  { %v142_v36 = vadd.f32 %v141_v34, %v39_v21  ;;  %v166_v37 = vadd.f32 %v165_v35, %v39_v21 }
  0xe2   :  { %181 = vst [vmem:[#allocation2 + $0x8] sm:$0xff] %v140_v32  ;;  %185 = vst [vmem:[#allocation2 + $0x28] sm:$0xff] %v164_v33 }
  0xe3   :  { %189 = vst [vmem:[#allocation4 + $0x8] sm:$0xff] %v142_v36  ;;  %193 = vst [vmem:[#allocation4 + $0x28] sm:$0xff] %v166_v37  ;;  %v145_v38 = vpop.f32.mrb[4].mxu0  ;;  %v169_v39 = vpop.f32.mrb[4].mxu1 }
  0xe4   :  { %v146_v40 = vadd.f32 %v145_v38, %v35_v20  ;;  %v170_v41 = vadd.f32 %v169_v39, %v35_v20  ;;  %v147_v42 = vpop.f32.mrb[5].mxu0  ;;  %v171_v43 = vpop.f32.mrb[5].mxu1 }
  0xe5   :  { %v148_v44 = vadd.f32 %v147_v42, %v39_v21  ;;  %v172_v45 = vadd.f32 %v171_v43, %v39_v21 }
  0xe6   :  { %182 = vst [vmem:[#allocation2 + $0x10] sm:$0xff] %v146_v40  ;;  %186 = vst [vmem:[#allocation2 + $0x30] sm:$0xff] %v170_v41 }
  0xe7   :  { %190 = vst [vmem:[#allocation4 + $0x10] sm:$0xff] %v148_v44  ;;  %194 = vst [vmem:[#allocation4 + $0x30] sm:$0xff] %v172_v45  ;;  %v151_v46 = vpop.f32.mrb[6].mxu0  ;;  %v175_v47 = vpop.f32.mrb[6].mxu1 }
  0xe8   :  { %v152_v48 = vadd.f32 %v151_v46, %v35_v20  ;;  %v176_v49 = vadd.f32 %v175_v47, %v35_v20  ;;  %v153_v50 = vpop.f32.mrb[7].mxu0  ;;  %v177_v51 = vpop.f32.mrb[7].mxu1 }
  0xe9   :  { %v154_v52 = vadd.f32 %v153_v50, %v39_v21  ;;  %v178_v53 = vadd.f32 %v177_v51, %v39_v21 }
  0xea   :  { %183 = vst [vmem:[#allocation2 + $0x18] sm:$0xff] %v152_v48  ;;  %187 = vst [vmem:[#allocation2 + $0x38] sm:$0xff] %v176_v49 }
  0xeb   :  { %191 = vst [vmem:[#allocation4 + $0x18] sm:$0xff] %v154_v52  ;;  %195 = vst [vmem:[#allocation4 + $0x38] sm:$0xff] %v178_v53 }
  0xec   :  { %258 = shalt.err (!%p255_p4)
}
  0xed   :  { %s259_s19 = scalar_lea.hbm %s413_s3, 1024 }
  0xee   :  { %p260_p5 = scmp.ne.s32.totalorder %s413_s3, %s259_s19  ;;  %p263_p6 = scmp.lt.u32.totalorder %s259_s19, %s413_s3 }
  0xf0   :  { %p265_p7 = pnand %p263_p6, %p260_p5 }
  0xf2   :  { %268 = shalt.err (!%p265_p7)
}
  0xf3   :  { %s298_s24 = smov 128   ;;  %s299_s25 = smov 8  }
  0xf4   :  { %207 = dma.vmem_to_hbm [thread:$0]  %s372_s2, 1024, %s413_s3, [#allocation3], %s298_s24, %s298_s24, %s299_s25  }
  0xf5   :  { %s269_s27 = scalar_lea.vmem %s374_s15, 1024  ;;  %p274_p9 = scmp.lt.s32.totalorder %s374_s15, %s374_s15 }
  0xf6   :  { %p270_p8 = scmp.ne.s32.totalorder %s374_s15, %s269_s27  ;;  %p275_p10 = scmp.lt.s32.totalorder %s269_s27, %s269_s27 }
  0xf8   :  { %p276_p11 = por %p275_p10, %p274_p9 }
  0xfa   :  { %p277_p12 = pnand %p276_p11, %p270_p8 }
  0xfc   :  { %280 = shalt.err (!%p277_p12)
}
  0xfd   :  { %s281_s30 = scalar_lea.hbm %s414_s4, 1024 }
  0xfe   :  { %p282_p13 = scmp.ne.s32.totalorder %s414_s4, %s281_s30  ;;  %p285_p0 = scmp.lt.u32.totalorder %s281_s30, %s414_s4 }
 0x100   :  { %p287_p1 = pnand %p285_p0, %p282_p13 }
 0x102   :  { %290 = shalt.err (!%p287_p1)
}
 0x103   :  { %219 = dma.vmem_to_hbm [thread:$0]  %s374_s15, 1024, %s414_s4, [#allocation5], %s298_s24, %s298_s24, %s299_s25  }
 0x104   :  { %291 = dma.done.wait [#allocation3], 1024  }
 0x105   :  { %292 = vsyncadd [#allocation3], 4294966272 }
 0x106   :  { %293 = dma.done.wait [#allocation5], 1024  }
 0x107   :  { %294 = vsyncadd [#allocation5], 4294966272 }
 0x108   :  { %226 = vsyncpa [#allocation3], 1 }
 0x109   :  { %227 = vsyncpa [#allocation5], 1 }

</bundles_post_ra>
